<compile_context>
chip_gen: v5e
topology: v5e:2x2
jax: 0.10.0
libtpu: 0.0.40
codegen_flags: <defaults>
</compile_context>

<pallas_src>
import functools

import jax
import jax.numpy as jnp
from jax import lax
from jax.experimental import pallas as pl
from jax.experimental.pallas import tpu as pltpu

BT_LAMBDA = 0.0051  # Barlow-Twins off-diagonal weight (paper default)
BN_EPS = 1e-5       # torch.nn.BatchNorm1d default eps


def _round_up(x, m):
    return ((x + m - 1) // m) * m


def _gram_kernel(img_ref, g_ref, *, d_valid, num_full, num_k_total, k_per_core):
    """Accumulate a partial image Gram (X @ X.T) for this split into g_ref[:, :N]."""
    c = pl.program_id(0)            # split ("parallel") index
    k = pl.program_id(1)            # reduction step within this split
    n, tk = img_ref.shape
    kg = c * k_per_core + k         # global tile index along D

    @pl.when(k == 0)
    def _init():
        g_ref[...] = jnp.zeros_like(g_ref)

    # Full tiles: no masking cost on the hot path.
    @pl.when(kg < num_full)
    def _full():
        x = img_ref[...]
        g_ref[:, :n] += lax.dot_general(
            x, x, (((1,), (1,)), ((), ())), preferred_element_type=jnp.float32)

    # Ragged last tile (D % TK != 0): lane mask paid on this single step only.
    if num_k_total > num_full:      # static
        @pl.when(kg == num_full)
        def _tail():
            x = img_ref[...]
            col = lax.broadcasted_iota(jnp.int32, x.shape, 1) + num_full * tk
            x = jnp.where(col < d_valid, x, jnp.zeros_like(x))
            g_ref[:, :n] += lax.dot_general(
                x, x, (((1,), (1,)), ((), ())), preferred_element_type=jnp.float32)

    # Steps with kg >= num_k_total (uneven split overrun) contribute nothing.


def _losses_from_gram(g_img, e1, e2, barlow_weight):
    """Cheap epilogue in plain JAX: cdist/MSE + BatchNorm'd Barlow-Twins loss."""
    n = g_img.shape[0]
    e1 = e1.astype(jnp.float32)
    e2 = e2.astype(jnp.float32)

    # DistanceLoss: MSE(cdist(mean embedding), cdist(flattened image)).
    # Image cdist from the streamed Gram; embedding cdist via explicit differences (tiny).
    diag = jnp.diagonal(g_img)
    d2_img = jnp.maximum(diag[:, None] + diag[None, :] - 2.0 * g_img, 0.0)
    d_img = jnp.sqrt(d2_img)

    emb = (e1 + e2) * 0.5
    diff = emb[:, None, :] - emb[None, :, :]
    d_emb = jnp.sqrt(jnp.sum(diff * diff, axis=-1))
    dist_loss = jnp.mean((d_emb - d_img) ** 2)

    # BTLoss: Barlow Twins with BatchNorm1d(affine=False), training-mode batch stats.
    def bn(z):
        mu = jnp.mean(z, axis=0, keepdims=True)
        var = jnp.mean((z - mu) ** 2, axis=0, keepdims=True)   # biased variance
        return (z - mu) * lax.rsqrt(var + BN_EPS)

    c = bn(e1).T @ bn(e2) / n
    cd = jnp.diagonal(c)
    on_diag = jnp.sum((cd - 1.0) ** 2)
    off_diag = jnp.sum(c * c) - jnp.sum(cd * cd)
    bt_loss = on_diag + BT_LAMBDA * off_diag

    total = dist_loss + barlow_weight * bt_loss
    return total, dist_loss, bt_loss


def barlow_dist(image, embeddings_1, embeddings_2, barlow_weight=10000.0,
                tk=None, num_splits=2, buffers=2, stream_dtype=None):
    """Forward pass of BarlowDist.

    image: [N, C, H, W] (any float dtype; streamed in native dtype unless stream_dtype given)
    embeddings_*: [N, E]
    tk: feature-dim tile (multiple of 128); default targets ~2 MiB per streamed buffer.
    num_splits: leading parallel grid axis (2 uses both TensorCores on v7x).
    buffers: pipeline depth for the image stream (>2 enables pl.Buffered).
    """
    # Static clamp, mirroring the nn.Module constructor.
    barlow_weight = max(0.0, float(barlow_weight))

    n = image.shape[0]
    d = 1
    for s in image.shape[1:]:
        d *= s
    assert d < 2 ** 31, "flattened feature dim must fit int32 tile offsets"

    img_flat = image.reshape(n, d)
    if stream_dtype is not None:
        img_flat = img_flat.astype(stream_dtype)   # e.g. bf16: halves HBM traffic
    itemsize = img_flat.dtype.itemsize

    # ---- tile size: ~2 MiB per streamed buffer, rounded to 128, clamped to D ----
    if tk is None:
        tk = (2 * 1024 * 1024) // max(1, n * itemsize)
    tk = max(128, min(int(tk), _round_up(d, 128)))
    tk = _round_up(tk, 128)

    num_k_total = pl.cdiv(d, tk)
    num_full = d // tk
    nc = max(1, int(num_splits))
    k_per_core = pl.cdiv(num_k_total, nc)
    npad = _round_up(n, 128)                       # lane-dense output block

    # ---- VMEM budget: pipelined image buffers + one tail-mask temp + output blocks ----
    tile_bytes = n * tk * itemsize
    vmem_limit = int(max(2, int(buffers)) * tile_bytes
                     + n * tk * 4
                     + 2 * n * npad * 4
                     + (2 << 20))
    vmem_limit = min(max(vmem_limit, 16 << 20), 64 << 20)

    kernel = functools.partial(_gram_kernel, d_valid=d, num_full=num_full,
                               num_k_total=num_k_total, k_per_core=k_per_core)

    img_spec_kwargs = {}
    if buffers and int(buffers) > 2:
        img_spec_kwargs["pipeline_mode"] = pl.Buffered(int(buffers))
    img_spec = pl.BlockSpec(
        (n, tk),
        lambda c, k: (0, jnp.minimum(c * k_per_core + k, num_k_total - 1)),
        **img_spec_kwargs)

    cost = pl.CostEstimate(
        flops=int(2 * n * n * d),
        transcendentals=0,
        bytes_accessed=int(n * d * itemsize + nc * n * npad * 4))

    g_parts = pl.pallas_call(
        kernel,
        out_shape=jax.ShapeDtypeStruct((nc, n, npad), jnp.float32),
        grid_spec=pltpu.PrefetchScalarGridSpec(
            num_scalar_prefetch=0,
            grid=(nc, k_per_core),
            in_specs=[img_spec],
            out_specs=pl.BlockSpec((None, n, npad), lambda c, k: (c, 0, 0)),
        ),
        compiler_params=pltpu.CompilerParams(
            dimension_semantics=("parallel", "arbitrary"),
            vmem_limit_bytes=vmem_limit),
        cost_estimate=cost,
    )(img_flat)

    g_img = jnp.sum(g_parts[:, :, :n], axis=0)     # combine per-split partial Grams
    return _losses_from_gram(g_img, embeddings_1, embeddings_2, barlow_weight)


def _reference(image, e1, e2, barlow_weight=10000.0):
    """Pure-JAX reference of the same semantics (for correctness check)."""
    n = image.shape[0]
    x = image.reshape(n, -1).astype(jnp.float32)
    e1 = e1.astype(jnp.float32)
    e2 = e2.astype(jnp.float32)
    emb = (e1 + e2) / 2.0

    def cdist(a):
        d2 = jnp.sum((a[:, None, :] - a[None, :, :]) ** 2, axis=-1)
        return jnp.sqrt(jnp.maximum(d2, 0.0))

    dist_loss = jnp.mean((cdist(emb) - cdist(x)) ** 2)

    def bn(z):
        mu = z.mean(axis=0)
        var = z.var(axis=0)
        return (z - mu) / jnp.sqrt(var + BN_EPS)

    c = bn(e1).T @ bn(e2) / n
    diag = jnp.diag(c)
    on = jnp.sum((diag - 1.0) ** 2)
    off = jnp.sum(c ** 2) - jnp.sum(diag ** 2)
    bt = on + BT_LAMBDA * off
    return dist_loss + barlow_weight * bt, dist_loss, bt


if __name__ == "__main__":
    key = jax.random.PRNGKey(0)
    k1, k2, k3 = jax.random.split(key, 3)

    N, C, H, W, E = 8, 4, 16, 16, 32          # D = C*H*W = 1024
    image = jax.random.normal(k1, (N, C, H, W), dtype=jnp.float32)
    embeddings_1 = jax.random.normal(k2, (N, E), dtype=jnp.float32)
    embeddings_2 = jax.random.normal(k3, (N, E), dtype=jnp.float32)

    r_total, r_dist, r_bt = _reference(image, embeddings_1, embeddings_2, 10000.0)

    # 1) Default tile: single tile per split; the second split fully overruns (masked out).
    total, dist_loss, bt_loss = barlow_dist(image, embeddings_1, embeddings_2, 10000.0)
    jax.block_until_ready((total, dist_loss, bt_loss))
    assert jnp.allclose(dist_loss, r_dist, rtol=1e-3, atol=1e-3), (dist_loss, r_dist)
    assert jnp.allclose(bt_loss, r_bt, rtol=1e-3, atol=1e-3), (bt_loss, r_bt)
    assert jnp.allclose(total, r_total, rtol=1e-3, atol=1e-2), (total, r_total)

    # 2) Small even tile: 1024/256 -> 4 full tiles, split 2x2 across the parallel axis.
    total2, dist2, bt2 = barlow_dist(image, embeddings_1, embeddings_2, 10000.0, tk=256)
    jax.block_until_ready((total2, dist2, bt2))
    assert jnp.allclose(dist2, r_dist, rtol=1e-3, atol=1e-3), (dist2, r_dist)
    assert jnp.allclose(bt2, r_bt, rtol=1e-3, atol=1e-3), (bt2, r_bt)
    assert jnp.allclose(total2, r_total, rtol=1e-3, atol=1e-2), (total2, r_total)

    # 3) Ragged tile: 1024/384 -> 3 tiles (1 partial), uneven 2-way split -> exercises the
    #    last-step-only tail mask, the overrun guard, and the clamped index_map.
    total3, dist3, bt3 = barlow_dist(image, embeddings_1, embeddings_2, 10000.0, tk=384)
    jax.block_until_ready((total3, dist3, bt3))
    assert jnp.allclose(dist3, r_dist, rtol=1e-3, atol=1e-3), (dist3, r_dist)
    assert jnp.allclose(bt3, r_bt, rtol=1e-3, atol=1e-3), (bt3, r_bt)
    assert jnp.allclose(total3, r_total, rtol=1e-3, atol=1e-2), (total3, r_total)

    print("KERNEL_OK")
</pallas_src>

<mosaic_0001>
module attributes {stable_mosaic.version = 11 : i64} {
  func.func @_gram_kernel(%arg0: i32, %arg1: i32, %arg2: memref<8x1024xf32, #tpu.memory_space<vmem>>, %arg3: memref<1x8x128xf32, #tpu.memory_space<vmem>>) attributes {dimension_semantics = [#tpu.dimension_semantics<parallel>, #tpu.dimension_semantics<arbitrary>], iteration_bounds = array<i64: 2, 1>, scalar_prefetch = 0 : i64, scratch_operands = 0 : i64, tpu.core_type = #tpu.core_type<tc>, window_params = [{transform_indices = @transform_0, window_bounds = array<i64: 8, 1024>}, {transform_indices = @transform_1, window_bounds = array<i64: 1, 8, 128>}]} {
    %c1_i32 = arith.constant 1 : i32
    %0 = arith.muli %arg0, %c1_i32 : i32
    %1 = arith.addi %0, %arg1 : i32
    %c0_i32 = arith.constant 0 : i32
    %2 = arith.cmpi eq, %arg1, %c0_i32 : i32
    %3 = arith.extui %2 : i1 to i32
    %c0_i32_0 = arith.constant 0 : i32
    %4 = arith.cmpi ne, %3, %c0_i32_0 : i32
    scf.if %4 {
      %cst = arith.constant 0.000000e+00 : f32
      %8 = vector.broadcast %cst : f32 to vector<8x128xf32>
      %c0 = arith.constant 0 : index
      %c0_3 = arith.constant 0 : index
      %c0_4 = arith.constant 0 : index
      %9 = vector.load %arg3[%c0, %c0_3, %c0_4] : memref<1x8x128xf32, #tpu.memory_space<vmem>>, vector<1x8x128xf32>
      %10 = vector.shape_cast %9 : vector<1x8x128xf32> to vector<8x128xf32>
      %11 = vector.shape_cast %8 : vector<8x128xf32> to vector<1x8x128xf32>
      tpu.vector_store %arg3[%c0, %c0_3, %c0_4], %11 {strides = array<i32>} : memref<1x8x128xf32, #tpu.memory_space<vmem>>, vector<1x8x128xf32>,
    } else {
    }
    %c1_i32_1 = arith.constant 1 : i32
    %5 = arith.cmpi slt, %1, %c1_i32_1 : i32
    %6 = arith.extui %5 : i1 to i32
    %c0_i32_2 = arith.constant 0 : i32
    %7 = arith.cmpi ne, %6, %c0_i32_2 : i32
    scf.if %7 {
      %c0 = arith.constant 0 : index
      %c0_3 = arith.constant 0 : index
      %8 = vector.load %arg2[%c0, %c0_3] : memref<8x1024xf32, #tpu.memory_space<vmem>>, vector<8x1024xf32>
      %c0_4 = arith.constant 0 : index
      %c0_5 = arith.constant 0 : index
      %c0_6 = arith.constant 0 : index
      %9 = vector.load %arg3[%c0_4, %c0_5, %c0_6] : memref<1x8x128xf32, #tpu.memory_space<vmem>>, vector<1x8x8xf32>
      %10 = vector.shape_cast %9 : vector<1x8x8xf32> to vector<8x8xf32>
      %cst = arith.constant dense<0.000000e+00> : vector<8x8xf32>
      %11 = tpu.matmul %8, %8, %cst {dimension_numbers = #tpu.dot_dimension_numbers<[1], [1], [0], [0], [0, 0, 1, 0], [], []>} : vector<8x1024xf32>, vector<8x1024xf32>, vector<8x8xf32> -> vector<8x8xf32>
      %12 = arith.addf %10, %11 : vector<8x8xf32>
      %c0_7 = arith.constant 0 : index
      %c0_8 = arith.constant 0 : index
      %c0_9 = arith.constant 0 : index
      %13 = vector.load %arg3[%c0_7, %c0_8, %c0_9] : memref<1x8x128xf32, #tpu.memory_space<vmem>>, vector<1x8x8xf32>
      %14 = vector.shape_cast %13 : vector<1x8x8xf32> to vector<8x8xf32>
      %15 = vector.shape_cast %12 : vector<8x8xf32> to vector<1x8x8xf32>
      tpu.vector_store %arg3[%c0_7, %c0_8, %c0_9], %15 {strides = array<i32>} : memref<1x8x128xf32, #tpu.memory_space<vmem>>, vector<1x8x8xf32>,
    } else {
    }
    return
  }
  func.func @transform_0(%arg0: i32, %arg1: i32) -> (i32, i32) {
    %c1_i32 = arith.constant 1 : i32
    %0 = arith.muli %arg0, %c1_i32 : i32
    %1 = arith.addi %0, %arg1 : i32
    %c0_i32 = arith.constant 0 : i32
    %2 = arith.minsi %1, %c0_i32 : i32
    %c0_i32_0 = arith.constant 0 : i32
    %c0_i32_1 = arith.constant 0 : i32
    return %c0_i32_0, %2 : i32, i32
  }
  func.func @transform_1(%arg0: i32, %arg1: i32) -> (i32, i32, i32) {
    %c0_i32 = arith.constant 0 : i32
    %c0_i32_0 = arith.constant 0 : i32
    %c0_i32_1 = arith.constant 0 : i32
    return %arg0, %c0_i32, %c0_i32_0 : i32, i32, i32
  }
}

</mosaic_0001>

<bundles_post_ra>
// kernel: tpu_custom_call.1
= control target key start
LH: loop header
LB: loop body
LE: loop exit
PB: predicated region body
PF: predicated region fallthrough
CT: control target
= control target key end

     0   :  { %6 = vsyncpa [#allocation3], 0  ;;  %s841_s0 = inlined_call_operand.hbm [shape: f32[8,1024], index: 0, kind: input, shape index: {}]   ;;  %s842_s1 = inlined_call_operand.hbm [shape: f32[2,8,128], index: 1, kind: output, shape index: {}]  }
   0x1   :  { %8 = vsyncpa [#allocation3 + $0x1], 0 }
   0x2   :  { %9 = vsyncpa [#allocation4], 0 }
   0x3   :  { %11 = vsyncpa [#allocation4 + $0x1], 0  ;;  %s686_s6 = smov 0   ;;  %s688_s7 = smov 0  }
   0x4   :  { %s690_s8 = smov 0   ;;  %s692_s9 = smov 0  }
   0x5   :  { %s694_s10 = smov 0   ;;  %s696_s11 = smov 0  }
   0x6   :  { %s698_s12 = smov 0   ;;  %s700_s13 = smov 0  }
   0x7 LB: > { %s436_s14 = sadd.s32 4294967295, %s672_s13   ;;  %s437_s15 = sadd.s32 4294967294, %s672_s13   ;;  %s672_s13 = sphi %s700_s13, %s17_s13   ;;  %s668_s12 = sphi %s698_s12, %s853_s12   ;;  %s664_s11 = sphi %s696_s11, %s852_s11   ;;  %s660_s10 = sphi %s694_s10, %s831_s10   ;;  %s656_s9 = sphi %s692_s9, %s851_s9   ;;  %s652_s8 = sphi %s690_s8, %s850_s8   ;;  %s648_s7 = sphi %s688_s7, %s849_s7   ;;  %s644_s6 = sphi %s686_s6, %s848_s6  }
   0x8   : > { %s29_s16 = sadd.s32 1, %s668_s12  ;;  %p641_p1 = scmp.ne.s32.totalorder %s660_s10, 0 }
   0x9   : > { %p31_p0 = scmp.ge.s32.totalorder %s29_s16, 2  ;;  %p50_p2 = scmp.eq.s32.totalorder %s672_s13, 0 }
   0xa   : > { %p55_p3 = scmp.ne.s32.totalorder %s660_s10, %s656_s9  ;;  %p56_p5 = scmp.eq.s32.totalorder %s436_s14, 0 }
   0xb   : > { %s855_s16 = smov (%p31_p0, %s29_s16), 0  ;;  %p732_p4 = por %p641_p1, %p50_p2 }
   0xc   : > { %p736_p6 = por %p56_p5, %p55_p3  ;;  %s65_s19 = ssub.s32 %s668_s12, %s855_s16 }
   0xd   : > { %p66_p7 = scmp.eq.s32.totalorder %s65_s19, 0  ;;  %s68_s20 = sadd.s32 1, %s652_s8 }
   0xe   : > { %p78_p8 = scmp.ne.s32.totalorder %s652_s8, %s648_s7  ;;  %p79_p9 = scmp.eq.s32.totalorder %s436_s14, 1 }
   0xf   : > { %s744_s21 = scalar_select %p66_p7, %s652_s8, %s68_s20  }
  0x10   : > { %p84_p10 = scmp.ne.s32.totalorder %s648_s7, %s644_s6  ;;  %p85_p11 = scmp.eq.s32.totalorder %s437_s15, 1 }
  0x11   : > { %p750_p12 = por %p79_p9, %p78_p8  ;;  %p439_p13 = scmp.ge.s32.totalorder %s672_s13, 2 }
  0x12   : > { %p755_p0 = por %p85_p11, %p84_p10  ;;  %p464_p1 = scmp.lt.s32.totalorder %s672_s13, 2 }
  0x13   : > { %s119_s26 = sshll.u32 %s841_s0, 4  ;;  %s674_s27 = smov [#allocation2]   ;;  %s120_s26 = int_to_ptr.hbm [resolvable:$true] %s119_s26 }
  0x14   : > { %s121_s28 = sshll.u32 %s674_s27, 4  ;;  %p765_p2 = pnand %p464_p1, %p732_p4  ;;  %s122_s28 = int_to_ptr.vmem [resolvable:$true] %s121_s28 }
  0x15   : > { %p443_p3 = scmp.ge.s32.totalorder %s672_s13, 1  ;;  %p126_p5 = scmp.lt.s32.totalorder %s672_s13, 3 }
  0x16   : > { %s539_s30 = sshra.s32 %s120_s26, 4  ;;  %p543_p8 = pneg %p765_p2  ;;  %s540_s30 = int_to_ptr.hbm [resolvable:$true] %s539_s30 }
  0x17   : > { %s541_s2 = scalar_lea.hbm %s540_s30, 64  ;;  %s546_s5 = scalar_lea.hbm %s841_s0, 64 }
  0x18   : > { %p542_p7 = scmp.ne.s32.totalorder %s540_s30, %s541_s2  ;;  %p548_p11 = scmp.lt.s32.totalorder %s546_s5, %s541_s2 }
  0x1a   : > { %p544_p9 = pnand %p543_p8, %p542_p7 }
  0x1c   : > { %p545_p10 = pneg %p544_p9 }
  0x1e   : > { %p550_p4 = pnand %p548_p11, %p545_p10 }
  0x20   : > { %553 = shalt.err (!%p550_p4)
}
  0x21   : > { %459 = dma.hbm_to_vmem [thread:$0]  (!%p765_p2), %s120_s26, 1024, %s122_s28, [#allocation3]  }
  0x22   : > { %p127_p1 = pnand %p443_p3, %p126_p5 }
  0x23   : > { %s132_s9 = sand.u32 (!%p127_p1), 1, %s660_s10  }
  0x24   : > { %130 = sbr.rel (%p127_p1) target bundleno = 215 (0xd7), region = 24  ;;  %s444_s14 = sshll.u32 (!%p127_p1), %s132_s9, 6 }
  0x25   : > { %s133_s15 = scalar_lea.sflag (!%p127_p1), [#allocation3], %s132_s9  ;;  %s136_s17 = scalar_lea.vmem (!%p127_p1), [#allocation2], %s444_s14 }
  0x29   : > { %634 = dma.done.wait (%p736_p6), %s133_s15, 1024  }
  0x2a   : > { %636 = vsyncadd (%p736_p6), %s133_s15, 4294966272  ;;  %s153_s19 = sand.u32 1, %s648_s7   ;;  %v675_v0 = vmov 0.0   ;;  %p446_p2 = scmp.ge.s32.totalorder %s664_s11, 1 }
  0x2b   : > { %s445_s20 = sshll.u32 %s153_s19, 3 }
  0x2c   : > { %s790_s24 = scalar_lea.vmem [#allocation5], %s445_s20  ;;  %169 = sbr.rel (%p446_p2) target bundleno = 200 (0xc8), region = 36 }
  0x2d   : > { %165 = vst [vmem:[%s790_s24] sm:$0xff] %v675_v0 }
  0x31   : > { %v172_v1 = vld [vmem:[%s136_s17 + $0x10] sm:$0xff]  ;;  %v170_v2 = vld [vmem:[%s136_s17] sm:$0xff]  ;;  %v171_v3 = vld [vmem:[%s136_s17 + $0x8] sm:$0xff]  ;;  %vm340_vm0 = vcmask 64512  }
  0x32   : > { %234 = vmatpush.xpose.msra.mxu2 %v172_v1  ;;  %194 = vmatpush.xpose.msra.mxu0 %v170_v2  ;;  %v173_v4 = vld [vmem:[%s136_s17 + $0x18] sm:$0xff]  ;;  %v176_v5 = vld [vmem:[%s136_s17 + $0x30] sm:$0xff]  ;;  %v174_v6 = vld [vmem:[%s136_s17 + $0x20] sm:$0xff] }
  0x33   : > { %214 = vmatpush.xpose.msra.mxu1 %v171_v3  ;;  %254 = vmatpush.xpose.msra.mxu3 %v173_v4  ;;  %v177_v7 = vld [vmem:[%s136_s17 + $0x38] sm:$0xff]  ;;  %v175_v8 = vld [vmem:[%s136_s17 + $0x28] sm:$0xff] }
  0x34   : > { %v178_v23 = vld [vmem:[%s790_s24] sm:$0xff] }
  0x35   : > { %235 = vmatmul.f32.vlgmr.msra.gmra.mxu2 %v172_v1  ;;  %195 = vmatmul.f32.vlgmr.msra.gmra.mxu0 %v170_v2 }
  0x36   : > { %314 = vmatpush.xpose.msrb.mxu2 %v176_v5  ;;  %274 = vmatpush.xpose.msrb.mxu0 %v174_v6 }
  0x37   : > { %215 = vmatmul.f32.vlgmr.msra.gmra.mxu1 %v171_v3  ;;  %255 = vmatmul.f32.vlgmr.msra.gmra.mxu3 %v173_v4 }
  0x38   : > { %334 = vmatpush.xpose.msrb.mxu3 %v177_v7  ;;  %294 = vmatpush.xpose.msrb.mxu1 %v175_v8 }
  0x3d   : > { %315 = vmatmul.f32.vlgmr.msrb.gmra.mxu2 %v176_v5  ;;  %275 = vmatmul.f32.vlgmr.msrb.gmra.mxu0 %v174_v6 }
  0x3f   : > { %335 = vmatmul.f32.vlgmr.msrb.gmra.mxu3 %v177_v7  ;;  %295 = vmatmul.f32.vlgmr.msrb.gmra.mxu1 %v175_v8 }
  0xb2   : > { %v196_v9 = vpop.f32.mrf.mxu0 }
  0xb4   : > { %v216_v10 = vpop.f32.mrf.mxu1 }
  0xb5   : > { %v217_v11 = vadd.f32 %v216_v10, %v196_v9 }
  0xb8   : > { %v236_v12 = vpop.f32.mrf.mxu2 }
  0xb9   : > { %v237_v13 = vadd.f32 %v236_v12, %v217_v11 }
  0xba   : > { %v256_v14 = vpop.f32.mrf.mxu3  ;;  %v276_v15 = vpop.f32.mrf.mxu0 }
  0xbb   : > { %v257_v16 = vadd.f32 %v256_v14, %v237_v13 }
  0xbc   : > { %v296_v17 = vpop.f32.mrf.mxu1 }
  0xbd   : > { %v277_v18 = vadd.f32 %v276_v15, %v257_v16 }
  0xbf   : > { %v297_v19 = vadd.f32 %v296_v17, %v277_v18 }
  0xc0   : > { %v316_v20 = vpop.f32.mrf.mxu2 }
  0xc1   : > { %v317_v21 = vadd.f32 %v316_v20, %v297_v19 }
  0xc2   : > { %v336_v22 = vpop.f32.mrf.mxu3 }
  0xc3   : > { %v337_v24 = vadd.f32 %v336_v22, %v317_v21 }
  0xc5   : > { %v339_v25 = vadd.f32 %v337_v24, %v178_v23 }
  0xc7   : > { %341 = vst.msk [vmem:[%s790_s24] sm:$0xff] %vm340_vm0, %v339_v25 }
  0xc8 PF: > { %s448_s18 = sshll.u32 %s664_s11, 3  ;;  %s355_s28 = sshll.u32 %s790_s24, 4  ;;  %s356_s28 = int_to_ptr.vmem [resolvable:$true] %s355_s28 }
  0xc9   : > { %s353_s27 = scalar_lea.hbm %s842_s1, %s448_s18  ;;  %s343_s30 = scalar_lea.sflag [#allocation4], %s153_s19 }
  0xca   : > { %s357_s29 = sshll.u32 %s353_s27, 4  ;;  %s589_s11 = scalar_lea.hbm %s842_s1, 16  ;;  %s358_s29 = int_to_ptr.hbm [resolvable:$true] %s357_s29 }
  0xcb   : > { %s583_s2 = sshra.s32 %s358_s29, 4  ;;  %s584_s2 = int_to_ptr.hbm [resolvable:$true] %s583_s2 }
  0xcc   : > { %s585_s3 = scalar_lea.hbm %s584_s2, 8  ;;  %p590_p7 = scmp.lt.s32.totalorder %s584_s2, %s842_s1 }
  0xcd   : > { %p586_p6 = scmp.ne.s32.totalorder %s584_s2, %s585_s3  ;;  %p591_p8 = scmp.lt.s32.totalorder %s589_s11, %s585_s3 }
  0xcf   : > { %p587_p3 = pnand %p586_p6, %p750_p12  ;;  %p592_p9 = por %p591_p8, %p590_p7 }
  0xd1   : > { %p588_p5 = pneg %p587_p3 }
  0xd3   : > { %p593_p10 = pnand %p592_p9, %p588_p5 }
  0xd5   : > { %596 = shalt.err (!%p593_p10)
}
  0xd6   : > { %454 = dma.vmem_to_hbm [thread:$0]  (%p750_p12), %s356_s28, 128, %s358_s29, %s343_s30  }
  0xd7 PF: > { %s369_s15 = sand.u32 1, %s644_s6   ;;  %p461_p11 = pnand %p439_p13, %p755_p0 }
  0xd8   : > { %s370_s17 = scalar_lea.sflag [#allocation4], %s369_s15 }
  0xd9   : > { %p462_p4 = pneg %p461_p11 }
  0xdb   : > { %638 = dma.done.wait (%p462_p4), %s370_s17, 128  }
  0xdc   : > { %640 = vsyncadd (%p462_p4), %s370_s17, 4294967168  ;;  %s17_s13 = sadd.s32 1, %s672_s13   ;;  %s848_s6 = smov %s648_s7 }
  0xdd   : > { %p14_p1 = scmp.ge.s32.totalorder %s17_s13, 4   ;;  %s849_s7 = smov %s652_s8 }
  0xde   : > { %s850_s8 = smov %s744_s21  ;;  %s851_s9 = smov %s660_s10 }
  0xdf   : > { %s831_s10 = smov 0   ;;  %s852_s11 = smov %s668_s12 }
  0xe0   : > { %s853_s12 = smov %s855_s16  ;;  %16 = sbr.rel (!%p14_p1) target bundleno = 7 (0x7), region = 77 }
  0xe5   :  { %376 = vsyncpa [#allocation3], 1 }
  0xe6   :  { %378 = vsyncpa [#allocation3 + $0x1], 1 }
  0xe7   :  { %379 = vsyncpa [#allocation4], 1 }
  0xe8   :  { %381 = vsyncpa [#allocation4 + $0x1], 1 }

</bundles_post_ra>
